<compile_context>
chip_gen: v5e
topology: v5e:2x2
jax: 0.10.0
libtpu: 0.0.40
codegen_flags: <defaults>
</compile_context>

<pallas_src>
import functools

import jax
import jax.numpy as jnp
from jax import lax
from jax.experimental import pallas as pl
from jax.experimental.pallas import tpu as pltpu


# ------------------------------- the kernel -------------------------------

def bert_sim_embeddings_kernel(ids_ref, feat_ref, table_ref, gamma_ref, beta_ref,
                               out_ref, *, eps, vocab):
    ids = ids_ref[...]                                          # (TN, 1) int32
    tn = ids.shape[0]

    # Embedding lookup as a one-hot matmul against the resident (V, H) table.
    onehot = (ids == lax.broadcasted_iota(jnp.int32, (tn, vocab), 1)
              ).astype(jnp.float32)                             # (TN, V)
    tte = jnp.dot(onehot, table_ref[...],
                  preferred_element_type=jnp.float32)           # (TN, H)

    # embeddings = token_type_embeddings + features
    x = tte + feat_ref[...]

    # LayerNorm over the hidden dim (f32 statistics).
    mean = jnp.mean(x, axis=-1, keepdims=True)
    var = jnp.mean(jnp.square(x - mean), axis=-1, keepdims=True)
    y = (x - mean) * lax.rsqrt(var + eps)
    out_ref[...] = y * gamma_ref[...] + beta_ref[...]
    # TODO(synk): nn.Dropout is identity in eval/inference mode; no RNG drop applied.


# ------------------------------- wrapper -----------------------------------

def _pick_block_tokens(n, cap=1024):
    """Largest divisor of n that is a multiple of 8 and <= cap (prefer grid >= 2)."""
    limit = min(cap, n // 2) if n >= 16 else min(cap, n)
    best = None
    for d in range(1, max(limit, 1) + 1):
        if n % d == 0 and d % 8 == 0:
            best = d
    if best is None:
        return n            # single full-array block (block dims == array dims is legal)
    return best


def bert_sim_embeddings(params, input_ids, token_type_ids, features,
                        eps=1e-12, block_tokens=None):
    B, S = input_ids.shape
    H = features.shape[-1]
    V = params["tte"].shape[0]
    N = B * S

    if token_type_ids is None:
        token_type_ids = jnp.zeros_like(input_ids)

    ids = token_type_ids.reshape(N, 1).astype(jnp.int32)
    feat = features.reshape(N, H).astype(jnp.float32)

    TN = _pick_block_tokens(N) if block_tokens is None else block_tokens
    grid = (N // TN,)

    per_blk = lambda shape: pl.BlockSpec(shape, lambda i: (i, 0))
    fixed = lambda shape: pl.BlockSpec(shape, lambda i: (0,) * len(shape))

    kernel = functools.partial(bert_sim_embeddings_kernel, eps=eps, vocab=V)

    cost = pl.CostEstimate(
        flops=int(N * (2 * V * H + 8 * H)),
        transcendentals=int(N),                     # one rsqrt per token row
        bytes_accessed=int(4 * (ids.size + feat.size + N * H + V * H + 2 * H)),
    )

    out = pl.pallas_call(
        kernel,
        out_shape=jax.ShapeDtypeStruct((N, H), jnp.float32),
        grid_spec=pltpu.PrefetchScalarGridSpec(
            num_scalar_prefetch=0,
            grid=grid,
            in_specs=[
                per_blk((TN, 1)),      # token_type_ids
                per_blk((TN, H)),      # features
                fixed((V, H)),         # token-type embedding table (resident)
                fixed((1, H)),         # layernorm gamma
                fixed((1, H)),         # layernorm beta
            ],
            out_specs=per_blk((TN, H)),
        ),
        compiler_params=pltpu.CompilerParams(
            dimension_semantics=("parallel",),
            vmem_limit_bytes=32 * 1024 * 1024,
        ),
        cost_estimate=cost,
    )(ids, feat,
      params["tte"].astype(jnp.float32),
      params["gamma"].reshape(1, H).astype(jnp.float32),
      params["beta"].reshape(1, H).astype(jnp.float32))

    return out.reshape(B, S, H)


# --------------------------- pure-JAX reference -----------------------------

def bert_sim_embeddings_ref(params, input_ids, token_type_ids, features, eps=1e-12):
    if token_type_ids is None:
        token_type_ids = jnp.zeros_like(input_ids)
    tte = jnp.take(params["tte"], token_type_ids, axis=0)
    x = tte + features
    mu = x.mean(-1, keepdims=True)
    var = ((x - mu) ** 2).mean(-1, keepdims=True)
    y = (x - mu) * lax.rsqrt(var + eps)
    return y * params["gamma"] + params["beta"]


# ----------------------------------- main -----------------------------------

if __name__ == "__main__":
    B, S, H = 2, 8, 32          # batch, seq, hidden
    V = 2                       # type_vocab_size
    eps = 1e-12

    key = jax.random.PRNGKey(0)
    k_tte, k_g, k_b, k_feat, k_ids, k_tt = jax.random.split(key, 6)

    params = dict(
        tte=0.05 * jax.random.normal(k_tte, (V, H), jnp.float32),
        gamma=1.0 + 0.02 * jax.random.normal(k_g, (H,), jnp.float32),
        beta=0.02 * jax.random.normal(k_b, (H,), jnp.float32),
    )

    input_ids = jax.random.randint(k_ids, (B, S), 0, 30000, jnp.int32)
    token_type_ids = jax.random.randint(k_tt, (B, S), 0, V, jnp.int32)
    features = jax.random.normal(k_feat, (B, S, H), jnp.float32)

    # run with explicit token_type_ids
    out = bert_sim_embeddings(params, input_ids, token_type_ids, features, eps=eps)
    out = jax.block_until_ready(out)
    ref = bert_sim_embeddings_ref(params, input_ids, token_type_ids, features, eps=eps)
    assert out.shape == (B, S, H)
    assert jnp.allclose(out, ref, atol=1e-5, rtol=1e-5), float(jnp.abs(out - ref).max())

    # run with token_type_ids=None (torch falls back to zeros)
    out0 = bert_sim_embeddings(params, input_ids, None, features, eps=eps)
    out0 = jax.block_until_ready(out0)
    ref0 = bert_sim_embeddings_ref(params, input_ids, None, features, eps=eps)
    assert jnp.allclose(out0, ref0, atol=1e-5, rtol=1e-5), float(jnp.abs(out0 - ref0).max())

    print("KERNEL_OK")
</pallas_src>

<mosaic_0001>
module attributes {stable_mosaic.version = 11 : i64} {
  func.func @bert_sim_embeddings_kernel(%arg0: i32, %arg1: memref<8x1xi32, #tpu.memory_space<vmem>>, %arg2: memref<8x32xf32, #tpu.memory_space<vmem>>, %arg3: memref<2x32xf32, #tpu.memory_space<vmem>>, %arg4: memref<1x32xf32, #tpu.memory_space<vmem>>, %arg5: memref<1x32xf32, #tpu.memory_space<vmem>>, %arg6: memref<8x32xf32, #tpu.memory_space<vmem>>) attributes {dimension_semantics = [#tpu.dimension_semantics<parallel>], iteration_bounds = array<i64: 2>, scalar_prefetch = 0 : i64, scratch_operands = 0 : i64, tpu.core_type = #tpu.core_type<tc>, window_params = [{transform_indices = @transform_0, window_bounds = array<i64: 8, 1>}, {transform_indices = @transform_1, window_bounds = array<i64: 8, 32>}, {pipeline_mode = #tpu.pipeline_mode<synchronous>, transform_indices = @transform_2, window_bounds = array<i64: 2, 32>}, {pipeline_mode = #tpu.pipeline_mode<synchronous>, transform_indices = @transform_3, window_bounds = array<i64: 1, 32>}, {pipeline_mode = #tpu.pipeline_mode<synchronous>, transform_indices = @transform_4, window_bounds = array<i64: 1, 32>}, {transform_indices = @transform_5, window_bounds = array<i64: 8, 32>}]} {
    %c0 = arith.constant 0 : index
    %c0_0 = arith.constant 0 : index
    %0 = vector.load %arg1[%c0, %c0_0] : memref<8x1xi32, #tpu.memory_space<vmem>>, vector<8x1xi32>
    %1 = tpu.iota {dimensions = array<i32: 1>} : vector<8x2xi32>
    %2 = vector.broadcast %0 : vector<8x1xi32> to vector<8x2xi32>
    %3 = arith.cmpi eq, %2, %1 : vector<8x2xi32>
    %4 = arith.extui %3 : vector<8x2xi1> to vector<8x2xi32>
    %5 = arith.sitofp %4 : vector<8x2xi32> to vector<8x2xf32>
    %c0_1 = arith.constant 0 : index
    %c0_2 = arith.constant 0 : index
    %6 = vector.load %arg3[%c0_1, %c0_2] : memref<2x32xf32, #tpu.memory_space<vmem>>, vector<2x32xf32>
    %cst = arith.constant dense<0.000000e+00> : vector<8x32xf32>
    %7 = tpu.matmul %5, %6, %cst {dimension_numbers = #tpu.dot_dimension_numbers<[1], [0], [0], [1], [0, 0, 1, 1], [], []>} : vector<8x2xf32>, vector<2x32xf32>, vector<8x32xf32> -> vector<8x32xf32>
    %c0_3 = arith.constant 0 : index
    %c0_4 = arith.constant 0 : index
    %8 = vector.load %arg2[%c0_3, %c0_4] : memref<8x32xf32, #tpu.memory_space<vmem>>, vector<8x32xf32>
    %9 = arith.addf %7, %8 : vector<8x32xf32>
    %cst_5 = arith.constant dense<0.000000e+00> : vector<8xf32>
    %10 = vector.multi_reduction <add>, %9, %cst_5 [1] : vector<8x32xf32> to vector<8xf32>
    %11 = vector.shape_cast %10 : vector<8xf32> to vector<8x1xf32>
    %cst_6 = arith.constant 3.200000e+01 : f32
    %12 = vector.broadcast %cst_6 : f32 to vector<8x1xf32>
    %13 = arith.divf %11, %12 : vector<8x1xf32>
    %14 = vector.broadcast %13 : vector<8x1xf32> to vector<8x32xf32>
    %15 = arith.subf %9, %14 : vector<8x32xf32>
    %16 = arith.mulf %15, %15 : vector<8x32xf32>
    %cst_7 = arith.constant dense<0.000000e+00> : vector<8xf32>
    %17 = vector.multi_reduction <add>, %16, %cst_7 [1] : vector<8x32xf32> to vector<8xf32>
    %18 = vector.shape_cast %17 : vector<8xf32> to vector<8x1xf32>
    %cst_8 = arith.constant 3.200000e+01 : f32
    %19 = vector.broadcast %cst_8 : f32 to vector<8x1xf32>
    %20 = arith.divf %18, %19 : vector<8x1xf32>
    %21 = vector.broadcast %13 : vector<8x1xf32> to vector<8x32xf32>
    %22 = arith.subf %9, %21 : vector<8x32xf32>
    %cst_9 = arith.constant 9.99999996E-13 : f32
    %23 = vector.broadcast %cst_9 : f32 to vector<8x1xf32>
    %24 = arith.addf %20, %23 : vector<8x1xf32>
    %25 = math.rsqrt %24 : vector<8x1xf32>
    %26 = vector.broadcast %25 : vector<8x1xf32> to vector<8x32xf32>
    %27 = arith.mulf %22, %26 : vector<8x32xf32>
    %c0_10 = arith.constant 0 : index
    %c0_11 = arith.constant 0 : index
    %28 = vector.load %arg4[%c0_10, %c0_11] : memref<1x32xf32, #tpu.memory_space<vmem>>, vector<1x32xf32>
    %29 = vector.broadcast %28 : vector<1x32xf32> to vector<8x32xf32>
    %30 = arith.mulf %27, %29 : vector<8x32xf32>
    %c0_12 = arith.constant 0 : index
    %c0_13 = arith.constant 0 : index
    %31 = vector.load %arg5[%c0_12, %c0_13] : memref<1x32xf32, #tpu.memory_space<vmem>>, vector<1x32xf32>
    %32 = vector.broadcast %31 : vector<1x32xf32> to vector<8x32xf32>
    %33 = arith.addf %30, %32 : vector<8x32xf32>
    %c0_14 = arith.constant 0 : index
    %c0_15 = arith.constant 0 : index
    %34 = vector.load %arg6[%c0_14, %c0_15] : memref<8x32xf32, #tpu.memory_space<vmem>>, vector<8x32xf32>
    tpu.vector_store %arg6[%c0_14, %c0_15], %33 {strides = array<i32>} : memref<8x32xf32, #tpu.memory_space<vmem>>, vector<8x32xf32>,
    return
  }
  func.func @transform_0(%arg0: i32) -> (i32, i32) {
    %c0_i32 = arith.constant 0 : i32
    %c0_i32_0 = arith.constant 0 : i32
    return %arg0, %c0_i32 : i32, i32
  }
  func.func @transform_1(%arg0: i32) -> (i32, i32) {
    %c0_i32 = arith.constant 0 : i32
    %c0_i32_0 = arith.constant 0 : i32
    return %arg0, %c0_i32 : i32, i32
  }
  func.func @transform_2(%arg0: i32) -> (i32, i32) {
    %c0_i32 = arith.constant 0 : i32
    %c0_i32_0 = arith.constant 0 : i32
    %c0_i32_1 = arith.constant 0 : i32
    return %c0_i32, %c0_i32_0 : i32, i32
  }
  func.func @transform_3(%arg0: i32) -> (i32, i32) {
    %c0_i32 = arith.constant 0 : i32
    %c0_i32_0 = arith.constant 0 : i32
    %c0_i32_1 = arith.constant 0 : i32
    return %c0_i32, %c0_i32_0 : i32, i32
  }
  func.func @transform_4(%arg0: i32) -> (i32, i32) {
    %c0_i32 = arith.constant 0 : i32
    %c0_i32_0 = arith.constant 0 : i32
    %c0_i32_1 = arith.constant 0 : i32
    return %c0_i32, %c0_i32_0 : i32, i32
  }
  func.func @transform_5(%arg0: i32) -> (i32, i32) {
    %c0_i32 = arith.constant 0 : i32
    %c0_i32_0 = arith.constant 0 : i32
    return %arg0, %c0_i32 : i32, i32
  }
}

</mosaic_0001>

<bundles_post_ra>
// kernel: tpu_custom_call.1
= control target key start
LH: loop header
LB: loop body
LE: loop exit
PB: predicated region body
PF: predicated region fallthrough
CT: control target
= control target key end

     0   :  { %10 = vsyncpa [#allocation3], 0  ;;  %s664_s0 = inlined_call_operand.vmem [shape: s32[16,1], index: 0, kind: input, shape index: {}]   ;;  %s665_s1 = inlined_call_operand.vmem [shape: f32[16,32], index: 1, kind: input, shape index: {}]   ;;  %s666_s2 = inlined_call_operand.vmem [shape: f32[2,32], index: 2, kind: input, shape index: {}]   ;;  %s667_s3 = inlined_call_operand.vmem [shape: f32[1,32], index: 3, kind: input, shape index: {}]   ;;  %s668_s4 = inlined_call_operand.vmem [shape: f32[1,32], index: 4, kind: input, shape index: {}]   ;;  %s669_s5 = inlined_call_operand.hbm [shape: f32[16,32], index: 5, kind: output, shape index: {}]  }
   0x1   :  { %12 = vsyncpa [#allocation3 + $0x1], 0  ;;  %s564_s18 = smov 0   ;;  %s566_s19 = smov 0  }
   0x2   :  { %s568_s20 = smov 0   ;;  %s570_s21 = smov 0  }
   0x3 LB: > { %s585_s22 = sadd.s32 4294967295, %s529_s21   ;;  %s404_s23 = sadd.s32 4294967294, %s529_s21   ;;  %s529_s21 = sphi %s570_s21, %s675_s21   ;;  %s525_s20 = sphi %s568_s20, %s674_s20   ;;  %s521_s19 = sphi %s566_s19, %s673_s19   ;;  %s517_s18 = sphi %s564_s18, %s672_s18  }
   0x4   : > { %s589_s24 = sadd.s32 1, %s529_s21   ;;  %s140_s25 = sadd.s32 1, %s525_s20 }
   0x5   : > { %s137_s26 = ssub.s32 %s529_s21, %s589_s24  ;;  %p150_p0 = scmp.ne.s32.totalorder %s525_s20, %s521_s19 }
   0x6   : > { %p138_p1 = scmp.eq.s32.totalorder %s137_s26, 0  ;;  %p151_p2 = scmp.eq.s32.totalorder %s585_s22, 1 }
   0x7   : > { %p156_p3 = scmp.ne.s32.totalorder %s521_s19, %s517_s18  ;;  %p157_p4 = scmp.eq.s32.totalorder %s404_s23, 1 }
   0x8   : > { %s600_s27 = scalar_select %p138_p1, %s525_s20, %s140_s25  }
   0x9   : > { %p602_p5 = por %p151_p2, %p150_p0  ;;  %p606_p6 = por %p157_p4, %p156_p3 }
   0xa   : > { %p407_p7 = scmp.ge.s32.totalorder %s529_s21, 1  ;;  %p198_p8 = scmp.lt.s32.totalorder %s529_s21, 3 }
   0xc   : > { %p199_p9 = pnand %p407_p7, %p198_p8 }
   0xd   : > { %p229_p10 = scmp.lt.s32.totalorder (!%p199_p9), %s585_s22, 1  ;;  %s226_s15 = sand.u32 (!%p199_p9), 1, %s521_s19  }
   0xe   : > { %202 = sbr.rel (%p199_p9) target bundleno = 540 (0x21c), region = 40  ;;  %s408_s16 = sshll.u32 (!%p199_p9), %s226_s15, 3 }
   0xf   : > { %s415_s17 = sshll.u32 (!%p199_p9), %s585_s22, 3  ;;  %s318_s11 = scalar_lea.sflag (!%p199_p9), [#allocation3], %s226_s15 }
  0x13   : > { %v531_v0 = vmov 0   ;;  %s230_s30 = scalar_select %p229_p10, %s585_s22, 1  ;;  %v246_v2 = vld [vmem:[%s666_s2] sm:$0x3]  ;;  %vm252_vm0 = vcmask 1041408   ;;  %v238_v3 = vlaneseq  ;;  %vm248_vm1 = vcmask 15360  }
  0x14   : > { %460 = vset.pattern.permute.xlu0 %v531_v0  ;;  %412 = vmatpush.msk.msra.mxu0 %vm252_vm0, %v246_v2  ;;  %v532_v6 = vmov 0.0   ;;  %vm276_vm3 = vcmask 261120   ;;  %v533_v12 = vmov 32.0   ;;  %v461_v33 = vld [vmem:[%s667_s3] ss:$0 sm:$0xff] }
  0x15   : > { %s409_s6 = sshll.u32 %s230_s30, 3  ;;  %v239_v4 = vand.u32 127, %v238_v3  ;;  %463 = vrcp.f32 %v533_v12  ;;  %v462_v36 = vld [vmem:[%s668_s4] ss:$0 sm:$0xff] }
  0x16   : > { %s232_s9 = scalar_lea.vmem %s664_s0, %s409_s6  ;;  %s236_s14 = scalar_lea.vmem %s665_s1, %s409_s6 }
  0x17   : > { %v237_v1 = vld [vmem:[%s232_s9] sm:$0xff]  ;;  %s328_s6 = scalar_lea.hbm %s669_s5, %s415_s17  ;;  %s228_s9 = scalar_lea.vmem [#allocation2], %s408_s16 }
  0x18   : > { %241 = vperm.xlu0 %460, %v237_v1   ;;  %v247_v8 = vld [vmem:[%s236_s14] sm:$0xff]  ;;  %s330_s22 = sshll.u32 %s228_s9, 4  ;;  %s332_s10 = sshll.u32 %s328_s6, 4  ;;  %s331_s22 = int_to_ptr.vmem [resolvable:$true] %s330_s22  ;;  %s333_s10 = int_to_ptr.hbm [resolvable:$true] %s332_s10 }
  0x19   : > { %s481_s12 = sshra.s32 %s333_s10, 4  ;;  %s487_s16 = scalar_lea.hbm %s669_s5, 16  ;;  %s482_s12 = int_to_ptr.hbm [resolvable:$true] %s481_s12 }
  0x1a   : > { %s483_s13 = scalar_lea.hbm %s482_s12, 8  ;;  %p488_p0 = scmp.lt.s32.totalorder %s482_s12, %s669_s5 }
  0x1b   : > { %v464_v13 = vpop.eup %463  ;;  %p484_p11 = scmp.ne.s32.totalorder %s482_s12, %s483_s13  ;;  %p489_p1 = scmp.lt.s32.totalorder %s487_s16, %s483_s13 }
  0x1c   : > { %v281_v14 = vmul.f32 32.0, %v464_v13  ;;  %vm285_vm4 = vweird.f32 %v464_v13 }
  0x1d   : > { %p485_p12 = pnand %p484_p11, %p602_p5  ;;  %p490_p2 = por %p489_p1, %p488_p0 }
  0x1e   : > { %v282_v15 = vsub.f32 1.0, %v281_v14 }
  0x1f   : > { %p486_p13 = pneg %p485_p12 }
  0x20   : > { %v283_v16 = vmul.f32 %v464_v13, %v282_v15 }
  0x21   : > { %p491_p3 = pnand %p490_p2, %p486_p13 }
  0x22   : > { %v284_v17 = vadd.f32 %v464_v13, %v283_v16 }
  0x24   : > { %v286_v18 = vsel %vm285_vm4, %v464_v13, %v284_v17 }
  0x8a   : > { %v242_v5 = vpop.permute.xlu0 %241 }
  0x8b   : > { %vm243_vm2 = vcmp.eq.s32.totalorder %v242_v5, %v239_v4 }
  0x8c   : > { %v411_v7 = vsel %vm243_vm2, 1.0, %v532_v6 }
  0x8d   : > { %413 = vmatmul.msk.f32.vlgmr.msra.gmra.mxu0 %vm248_vm1, %v411_v7 }
 0x10a   : > { %v273_v9 = vpop.f32.mrf.mxu0 }
 0x10b   : > { %v274_v10 = vadd.f32 %v273_v9, %v247_v8 }
 0x10d   : > { %v277_v11 = vsel %vm276_vm3, %v274_v10, 0.0 }
 0x10e   : > { %278 = vadd.xlane.f32.xlu0 %v277_v11 }
 0x181   : > { %v279_v19 = vpop.xlane.xlu0 %278 }
 0x182   : > { %v287_v20 = vmul.f32 %v286_v18, %v279_v19 }
 0x184   : > { %v288_v21 = vsub.f32 %v274_v10, %v287_v20 }
 0x186   : > { %v289_v22 = vmul.f32 %v288_v21, %v288_v21 }
 0x188   : > { %v290_v23 = vsel %vm276_vm3, %v289_v22, 0.0 }
 0x189   : > { %291 = vadd.xlane.f32.xlu1 %v290_v23 }
 0x1fc   : > { %v292_v24 = vpop.xlane.xlu1 %291 }
 0x1fd   : > { %v293_v25 = vmul.f32 %v292_v24, %v286_v18 }
 0x1ff   : > { %v294_v26 = vadd.f32 1e-12, %v293_v25 }
 0x201   : > { %465 = vrsqrt.f32 %v294_v26  ;;  %vm301_vm6 = vweird.f32 %v294_v26 }
 0x207   : > { %v466_v27 = vpop.eup %465 }
 0x208   : > { %v296_v28 = vmul.f32 %v466_v27, %v294_v26  ;;  %vm302_vm5 = vweird.f32 %v466_v27 }
 0x209   : > { %vm303_vm7 = vmor %vm301_vm6, %vm302_vm5 }
 0x20a   : > { %v297_v29 = vmul.f32 %v466_v27, %v296_v28 }
 0x20c   : > { %v298_v30 = vmul.f32 0.5, %v297_v29 }
 0x20e   : > { %v299_v31 = vsub.f32 1.5, %v298_v30 }
 0x210   : > { %v300_v32 = vmul.f32 %v466_v27, %v299_v31 }
 0x212   : > { %v304_v34 = vsel %vm303_vm7, %v466_v27, %v300_v32 }
 0x213   : > { %v305_v35 = vmul.f32 %v304_v34, %v288_v21 }
 0x215   : > { %v310_v37 = vmul.f32 %v461_v33, %v305_v35 }
 0x217   : > { %v315_v38 = vadd.f32 %v462_v36, %v310_v37 }
 0x219   : > { %316 = vst.msk [vmem:[%s228_s9] sm:$0xff] %vm276_vm3, %v315_v38 }
 0x21a   : > { %494 = shalt.err (!%p491_p3)
}
 0x21b   : > { %418 = dma.vmem_to_hbm [thread:$0]  (%p602_p5), %s331_s22, 128, %s333_s10, %s318_s11  }
 0x21c PF: > { %p424_p4 = scmp.ge.s32.totalorder %s529_s21, 2  ;;  %s344_s15 = sand.u32 1, %s517_s18  }
 0x21d   : > { %s345_s26 = scalar_lea.sflag [#allocation3], %s344_s15 }
 0x21e   : > { %p421_p7 = pnand %p424_p4, %p606_p6 }
 0x220   : > { %p422_p8 = pneg %p421_p7 }
 0x222   : > { %512 = dma.done.wait (%p422_p8), %s345_s26, 128  }
 0x223   : > { %514 = vsyncadd (%p422_p8), %s345_s26, 4294967168  ;;  %p15_p9 = scmp.ge.s32.totalorder %s589_s24, 4   ;;  %s672_s18 = smov %s521_s19 }
 0x224   : > { %s673_s19 = smov %s525_s20  ;;  %s674_s20 = smov %s600_s27 }
 0x225   : > { %s675_s21 = smov %s589_s24  ;;  %17 = sbr.rel (!%p15_p9) target bundleno = 3 (0x3), region = 78 }
 0x22a   :  { %351 = vsyncpa [#allocation3], 1 }
 0x22b   :  { %353 = vsyncpa [#allocation3 + $0x1], 1 }

</bundles_post_ra>
